<compile_context>
chip_gen: v6e
topology: v6e:2x2x1
jax: 0.10.0
libtpu: 0.0.40
codegen_flags: <defaults>
</compile_context>

<pallas_src>
import jax
import jax.numpy as jnp
from jax.experimental import pallas as pl
from jax.experimental.pallas import tpu as pltpu


def _round_up(x, m):
    return (x + m - 1) // m * m


def _clf_kernel(x_ref, w_ref, b_ref, o_ref):
    # x_ref: [TB, D_in]   w_ref: [D_in, D_out_p] (K,N layout)   b_ref: [1, D_out_p]
    x = x_ref[...]
    w = w_ref[...]
    if x.dtype != w.dtype:
        # bf16 MXU path: cast the streamed activations to the (bf16) param
        # dtype; accumulation stays f32 via preferred_element_type.
        x = x.astype(w.dtype)

    logits = jnp.dot(x, w, preferred_element_type=jnp.float32)
    logits = logits + b_ref[...]  # f32 bias broadcast over batch rows

    # Numerically-stable softmax over the last (lane) axis, all in f32.
    m = jnp.max(logits, axis=-1, keepdims=True)
    e = jnp.exp(logits - m)
    denom = jnp.sum(e, axis=-1, keepdims=True)

    # EUP approximate reciprocal + one Newton-Raphson refinement step
    # (near-exact f32, keeps the divide off the VPU critical path).
    r = pl.reciprocal(denom, approx=True)
    r = r * (2.0 - denom * r)

    o_ref[...] = (e * r).astype(o_ref.dtype)


def clf_init_params(weight, bias, *, param_dtype=jnp.bfloat16):
    """One-time parameter preparation (hoisted out of forward).

    weight: [D_out, D_in] (PyTorch layout), bias: [D_out].
    Returns (w_t, b_2d, D_out):
      w_t : [D_in, D_out_p] in `param_dtype`, MXU-native (K, N) layout.
      b_2d: [1, D_out_p] f32; padded columns get -1e30 so they softmax to 0.
    """
    D_out, D_in = weight.shape
    d_out_p = _round_up(D_out, 128)

    w_t = jnp.zeros((D_in, d_out_p), dtype=param_dtype)
    w_t = w_t.at[:, :D_out].set(weight.T.astype(param_dtype))

    # -1e30 (not -inf, kept in f32): exp underflows to exactly 0 because the
    # row max always comes from a real column.
    b_2d = jnp.full((1, d_out_p), -1e30, dtype=jnp.float32)
    b_2d = b_2d.at[0, :D_out].set(bias.astype(jnp.float32))
    return w_t, b_2d, D_out


def clf_forward(x, w_t, b_2d, d_out, *, tb_max=512):
    """x: [..., D_in]; w_t/b_2d/d_out from clf_init_params."""
    orig_shape = x.shape
    D_in = orig_shape[-1]
    d_out_p = w_t.shape[1]
    assert w_t.shape[0] == D_in

    x2 = x.reshape(-1, D_in)
    B = x2.shape[0]
    out_dtype = x2.dtype

    # Batch tiling: one full-extent block when B fits (no copy of x at all);
    # otherwise 512-row tiles (multiple of 256 -> fills MXU M), padding rows
    # only when the batch is ragged.
    if B <= tb_max:
        tb = B
        b_p = B
        x_p = x2
    else:
        tb = tb_max
        b_p = _round_up(B, tb)
        x_p = x2 if b_p == B else jnp.zeros((b_p, D_in), x2.dtype).at[:B].set(x2)

    grid = (b_p // tb,)

    # Explicit VMEM budget: resident weight + bias + 2x x-tile + 2x out-tile,
    # with headroom; clamped so it also fits v7x's 64 MiB/TC when small.
    needed = (w_t.size * w_t.dtype.itemsize
              + b_2d.size * b_2d.dtype.itemsize
              + 2 * tb * D_in * x_p.dtype.itemsize
              + 2 * tb * d_out_p * 4)
    vmem_limit = int(min(max(2 * needed + (4 << 20), 32 << 20), 96 << 20))

    def build(single_buffer_consts):
        # Constant-index (resident) operands: single-buffered when supported.
        const_kw = {}
        if single_buffer_consts:
            const_kw = dict(pipeline_mode=pl.Buffered(1))
        return pl.pallas_call(
            _clf_kernel,
            out_shape=jax.ShapeDtypeStruct((b_p, d_out_p), out_dtype),
            grid_spec=pltpu.PrefetchScalarGridSpec(
                num_scalar_prefetch=0,
                grid=grid,
                in_specs=[
                    # streaming x tile: new block each grid step (double-buffered)
                    pl.BlockSpec((tb, D_in), lambda i: (i, 0)),
                    # weight: constant index_map -> stays resident in VMEM
                    pl.BlockSpec((D_in, d_out_p), lambda i: (0, 0), **const_kw),
                    # bias: constant, tiny
                    pl.BlockSpec((1, d_out_p), lambda i: (0, 0), **const_kw),
                ],
                out_specs=pl.BlockSpec((tb, d_out_p), lambda i: (i, 0)),
            ),
            compiler_params=pltpu.CompilerParams(
                dimension_semantics=("parallel",),  # megacore-shardable on v7x
                vmem_limit_bytes=vmem_limit,
            ),
        )

    try:
        out_padded = build(True)(x_p, w_t, b_2d)
    except Exception:
        # Fallback for JAX versions without BlockSpec(pipeline_mode=Buffered(1)).
        out_padded = build(False)(x_p, w_t, b_2d)

    out = out_padded[:B, :d_out]
    return out.reshape(*orig_shape[:-1], d_out)


if __name__ == "__main__":
    # Small shapes consistent with Clf(input_dim, output_dim)
    B, D_in, D_out = 4, 32, 8

    key = jax.random.PRNGKey(0)
    kx, kw, kb = jax.random.split(key, 3)

    # Deterministic parameter init (PyTorch Linear-style uniform bound)
    bound = 1.0 / (D_in ** 0.5)
    x = jax.random.normal(kx, (B, D_in), dtype=jnp.float32)
    weight = jax.random.uniform(kw, (D_out, D_in), minval=-bound, maxval=bound,
                                dtype=jnp.float32)
    bias = jax.random.uniform(kb, (D_out,), minval=-bound, maxval=bound,
                              dtype=jnp.float32)

    # Reference in plain JAX
    ref = jax.nn.softmax(x @ weight.T + bias, axis=-1)

    # 1) f32-parameter path: tight parity with the f32 reference.
    w32, b32, dout = clf_init_params(weight, bias, param_dtype=jnp.float32)
    out32 = jax.block_until_ready(clf_forward(x, w32, b32, dout))
    assert out32.shape == (B, D_out)
    assert jnp.allclose(out32, ref, atol=1e-5, rtol=1e-5)
    assert jnp.allclose(jnp.sum(out32, axis=-1), 1.0, atol=1e-5)

    # 2) bf16-weight path (default fast path): bf16 MXU accuracy vs f32 ref.
    wbf, bbf, dout = clf_init_params(weight, bias)  # param_dtype=bfloat16
    outbf = jax.block_until_ready(clf_forward(x, wbf, bbf, dout))
    assert outbf.shape == (B, D_out)
    assert jnp.allclose(outbf, ref, atol=1e-2, rtol=1e-2)
    assert jnp.allclose(jnp.sum(outbf, axis=-1), 1.0, atol=1e-3)

    print("KERNEL_OK")
</pallas_src>

<mosaic_0001>
module attributes {stable_mosaic.version = 11 : i64} {
  func.func @_clf_kernel(%arg0: i32, %arg1: memref<4x32xf32, #tpu.memory_space<vmem>>, %arg2: memref<32x128xf32, #tpu.memory_space<vmem>>, %arg3: memref<1x128xf32, #tpu.memory_space<vmem>>, %arg4: memref<4x128xf32, #tpu.memory_space<vmem>>) attributes {dimension_semantics = [#tpu.dimension_semantics<parallel>], iteration_bounds = array<i64: 1>, scalar_prefetch = 0 : i64, scratch_operands = 0 : i64, tpu.core_type = #tpu.core_type<tc>, window_params = [{transform_indices = @transform_0, window_bounds = array<i64: 4, 32>}, {pipeline_mode = #tpu.pipeline_mode<synchronous>, transform_indices = @transform_1, window_bounds = array<i64: 32, 128>}, {pipeline_mode = #tpu.pipeline_mode<synchronous>, transform_indices = @transform_2, window_bounds = array<i64: 1, 128>}, {transform_indices = @transform_3, window_bounds = array<i64: 4, 128>}]} {
    %c0 = arith.constant 0 : index
    %c0_0 = arith.constant 0 : index
    %0 = vector.load %arg1[%c0, %c0_0] : memref<4x32xf32, #tpu.memory_space<vmem>>, vector<4x32xf32>
    %c0_1 = arith.constant 0 : index
    %c0_2 = arith.constant 0 : index
    %1 = vector.load %arg2[%c0_1, %c0_2] : memref<32x128xf32, #tpu.memory_space<vmem>>, vector<32x128xf32>
    %cst = arith.constant dense<0.000000e+00> : vector<4x128xf32>
    %2 = tpu.matmul %0, %1, %cst {dimension_numbers = #tpu.dot_dimension_numbers<[1], [0], [0], [1], [0, 0, 1, 1], [], []>} : vector<4x32xf32>, vector<32x128xf32>, vector<4x128xf32> -> vector<4x128xf32>
    %c0_3 = arith.constant 0 : index
    %c0_4 = arith.constant 0 : index
    %3 = vector.load %arg3[%c0_3, %c0_4] : memref<1x128xf32, #tpu.memory_space<vmem>>, vector<1x128xf32>
    %4 = vector.broadcast %3 : vector<1x128xf32> to vector<4x128xf32>
    %5 = arith.addf %2, %4 : vector<4x128xf32>
    %cst_5 = arith.constant dense<0xFF800000> : vector<4xf32>
    %6 = vector.multi_reduction <maximumf>, %5, %cst_5 [1] : vector<4x128xf32> to vector<4xf32>
    %7 = vector.shape_cast %6 : vector<4xf32> to vector<4x1xf32>
    %8 = vector.broadcast %7 : vector<4x1xf32> to vector<4x128xf32>
    %9 = arith.subf %5, %8 : vector<4x128xf32>
    %10 = math.exp %9 : vector<4x128xf32>
    %cst_6 = arith.constant dense<0.000000e+00> : vector<4xf32>
    %11 = vector.multi_reduction <add>, %10, %cst_6 [1] : vector<4x128xf32> to vector<4xf32>
    %12 = vector.shape_cast %11 : vector<4xf32> to vector<4x1xf32>
    %13 = tpu.reciprocal %12 {approx = true} : vector<4x1xf32> -> vector<4x1xf32>
    %14 = arith.mulf %12, %13 : vector<4x1xf32>
    %cst_7 = arith.constant 2.000000e+00 : f32
    %15 = vector.broadcast %cst_7 : f32 to vector<4x1xf32>
    %16 = arith.subf %15, %14 : vector<4x1xf32>
    %17 = arith.mulf %13, %16 : vector<4x1xf32>
    %18 = vector.broadcast %17 : vector<4x1xf32> to vector<4x128xf32>
    %19 = arith.mulf %10, %18 : vector<4x128xf32>
    %c0_8 = arith.constant 0 : index
    %c0_9 = arith.constant 0 : index
    %20 = vector.load %arg4[%c0_8, %c0_9] : memref<4x128xf32, #tpu.memory_space<vmem>>, vector<4x128xf32>
    tpu.vector_store %arg4[%c0_8, %c0_9], %19 {strides = array<i32>} : memref<4x128xf32, #tpu.memory_space<vmem>>, vector<4x128xf32>,
    return
  }
  func.func @transform_0(%arg0: i32) -> (i32, i32) {
    %c0_i32 = arith.constant 0 : i32
    %c0_i32_0 = arith.constant 0 : i32
    return %arg0, %c0_i32 : i32, i32
  }
  func.func @transform_1(%arg0: i32) -> (i32, i32) {
    %c0_i32 = arith.constant 0 : i32
    %c0_i32_0 = arith.constant 0 : i32
    %c0_i32_1 = arith.constant 0 : i32
    return %c0_i32, %c0_i32_0 : i32, i32
  }
  func.func @transform_2(%arg0: i32) -> (i32, i32) {
    %c0_i32 = arith.constant 0 : i32
    %c0_i32_0 = arith.constant 0 : i32
    %c0_i32_1 = arith.constant 0 : i32
    return %c0_i32, %c0_i32_0 : i32, i32
  }
  func.func @transform_3(%arg0: i32) -> (i32, i32) {
    %c0_i32 = arith.constant 0 : i32
    %c0_i32_0 = arith.constant 0 : i32
    return %arg0, %c0_i32 : i32, i32
  }
}

module attributes {stable_mosaic.version = 11 : i64} {
  func.func @_clf_kernel(%arg0: i32, %arg1: memref<4x32xf32, #tpu.memory_space<vmem>>, %arg2: memref<32x128xf32, #tpu.memory_space<vmem>>, %arg3: memref<1x128xf32, #tpu.memory_space<vmem>>, %arg4: memref<4x128xf32, #tpu.memory_space<vmem>>) attributes {dimension_semantics = [#tpu.dimension_semantics<parallel>], iteration_bounds = array<i64: 1>, scalar_prefetch = 0 : i64, scratch_operands = 0 : i64, tpu.core_type = #tpu.core_type<tc>, window_params = [{transform_indices = @transform_0, window_bounds = array<i64: 4, 32>}, {pipeline_mode = #tpu.pipeline_mode<synchronous>, transform_indices = @transform_1, window_bounds = array<i64: 32, 128>}, {pipeline_mode = #tpu.pipeline_mode<synchronous>, transform_indices = @transform_2, window_bounds = array<i64: 1, 128>}, {transform_indices = @transform_3, window_bounds = array<i64: 4, 128>}]} {
    %c0 = arith.constant 0 : index
    %c0_0 = arith.constant 0 : index
    %0 = vector.load %arg1[%c0, %c0_0] : memref<4x32xf32, #tpu.memory_space<vmem>>, vector<4x32xf32>
    %c0_1 = arith.constant 0 : index
    %c0_2 = arith.constant 0 : index
    %1 = vector.load %arg2[%c0_1, %c0_2] : memref<32x128xf32, #tpu.memory_space<vmem>>, vector<32x128xf32>
    %cst = arith.constant dense<0.000000e+00> : vector<4x128xf32>
    %2 = tpu.matmul %0, %1, %cst {dimension_numbers = #tpu.dot_dimension_numbers<[1], [0], [0], [1], [0, 0, 1, 1], [], []>} : vector<4x32xf32>, vector<32x128xf32>, vector<4x128xf32> -> vector<4x128xf32>
    %c0_3 = arith.constant 0 : index
    %c0_4 = arith.constant 0 : index
    %3 = vector.load %arg3[%c0_3, %c0_4] : memref<1x128xf32, #tpu.memory_space<vmem>>, vector<1x128xf32>
    %4 = vector.broadcast %3 : vector<1x128xf32> to vector<4x128xf32>
    %5 = arith.addf %2, %4 : vector<4x128xf32>
    %cst_5 = arith.constant dense<0xFF800000> : vector<4xf32>
    %6 = vector.multi_reduction <maximumf>, %5, %cst_5 [1] : vector<4x128xf32> to vector<4xf32>
    %7 = vector.shape_cast %6 : vector<4xf32> to vector<4x1xf32>
    %8 = vector.broadcast %7 : vector<4x1xf32> to vector<4x128xf32>
    %9 = arith.subf %5, %8 : vector<4x128xf32>
    %10 = math.exp %9 : vector<4x128xf32>
    %cst_6 = arith.constant dense<0.000000e+00> : vector<4xf32>
    %11 = vector.multi_reduction <add>, %10, %cst_6 [1] : vector<4x128xf32> to vector<4xf32>
    %12 = vector.shape_cast %11 : vector<4xf32> to vector<4x1xf32>
    %13 = tpu.reciprocal %12 {approx = true} : vector<4x1xf32> -> vector<4x1xf32>
    %14 = arith.mulf %12, %13 : vector<4x1xf32>
    %cst_7 = arith.constant 2.000000e+00 : f32
    %15 = vector.broadcast %cst_7 : f32 to vector<4x1xf32>
    %16 = arith.subf %15, %14 : vector<4x1xf32>
    %17 = arith.mulf %13, %16 : vector<4x1xf32>
    %18 = vector.broadcast %17 : vector<4x1xf32> to vector<4x128xf32>
    %19 = arith.mulf %10, %18 : vector<4x128xf32>
    %c0_8 = arith.constant 0 : index
    %c0_9 = arith.constant 0 : index
    %20 = vector.load %arg4[%c0_8, %c0_9] : memref<4x128xf32, #tpu.memory_space<vmem>>, vector<4x128xf32>
    tpu.vector_store %arg4[%c0_8, %c0_9], %19 {strides = array<i32>} : memref<4x128xf32, #tpu.memory_space<vmem>>, vector<4x128xf32>,
    return
  }
  func.func @transform_0(%arg0: i32) -> (i32, i32) {
    %c0_i32 = arith.constant 0 : i32
    %c0_i32_0 = arith.constant 0 : i32
    return %arg0, %c0_i32 : i32, i32
  }
  func.func @transform_1(%arg0: i32) -> (i32, i32) {
    %c0_i32 = arith.constant 0 : i32
    %c0_i32_0 = arith.constant 0 : i32
    %c0_i32_1 = arith.constant 0 : i32
    return %c0_i32, %c0_i32_0 : i32, i32
  }
  func.func @transform_2(%arg0: i32) -> (i32, i32) {
    %c0_i32 = arith.constant 0 : i32
    %c0_i32_0 = arith.constant 0 : i32
    %c0_i32_1 = arith.constant 0 : i32
    return %c0_i32, %c0_i32_0 : i32, i32
  }
  func.func @transform_3(%arg0: i32) -> (i32, i32) {
    %c0_i32 = arith.constant 0 : i32
    %c0_i32_0 = arith.constant 0 : i32
    return %arg0, %c0_i32 : i32, i32
  }
}

</mosaic_0001>

<bundles_post_ra>
// kernel: tpu_custom_call.1
= control target key start
LH: loop header
LB: loop body
LE: loop exit
PB: predicated region body
PF: predicated region fallthrough
CT: control target
= control target key end

     0   :  { %8 = vsyncpa [#allocation3], 0  ;;  %s293_s0 = inlined_call_operand.hbm [shape: f32[4,32], index: 0, kind: input, shape index: {}]   ;;  %s294_s1 = inlined_call_operand.hbm [shape: f32[32,128], index: 1, kind: input, shape index: {}]   ;;  %s295_s2 = inlined_call_operand.vmem [shape: f32[1,128], index: 2, kind: input, shape index: {}]   ;;  %s296_s3 = inlined_call_operand.hbm [shape: f32[4,128], index: 3, kind: output, shape index: {}]  }
   0x1   :  { %9 = vsyncpa [#allocation6], 0 }
   0x2   :  { %10 = vsyncpa [#allocation4], 0  ;;  %s254_s12 = smov [#allocation2]   ;;  %s255_s14 = smov [#allocation5]  }
   0x3   :  { %s17_s13 = sshll.u32 %s254_s12, 4  ;;  %s26_s15 = sshll.u32 %s255_s14, 4  ;;  %s18_s13 = int_to_ptr.vmem [resolvable:$true] %s17_s13  ;;  %s27_s15 = int_to_ptr.vmem [resolvable:$true] %s26_s15 }
   0x4   :  { %s196_s16 = scalar_lea.vmem %s18_s13, 64  ;;  %p201_p1 = scmp.lt.s32.totalorder %s18_s13, %s18_s13 }
   0x5   :  { %p197_p0 = scmp.ne.s32.totalorder %s18_s13, %s196_s16  ;;  %p202_p2 = scmp.lt.s32.totalorder %s196_s16, %s196_s16 }
   0x7   :  { %p203_p3 = por %p202_p2, %p201_p1 }
   0x9   :  { %p204_p4 = pnand %p203_p3, %p197_p0 }
   0xb   :  { %207 = shalt.err (!%p204_p4)
}
   0xc   :  { %20 = dma.hbm_to_vmem [thread:$0]  %s293_s0, 64, %s18_s13, [#allocation3]  }
   0xd   :  { %s216_s19 = scalar_lea.vmem %s27_s15, 512  ;;  %p221_p6 = scmp.lt.s32.totalorder %s27_s15, %s27_s15 }
   0xe   :  { %p217_p5 = scmp.ne.s32.totalorder %s27_s15, %s216_s19  ;;  %p222_p7 = scmp.lt.s32.totalorder %s216_s19, %s216_s19 }
  0x10   :  { %p223_p8 = por %p222_p7, %p221_p6 }
  0x12   :  { %p224_p9 = pnand %p223_p8, %p217_p5 }
  0x14   :  { %227 = shalt.err (!%p224_p9)
}
  0x15   :  { %s256_s20 = smov 128   ;;  %s257_s21 = smov 8  }
  0x16   :  { %32 = dma.hbm_to_vmem [thread:$0]  %s294_s1, 512, %s27_s15, [#allocation6], %s256_s20, %s256_s20, %s257_s21  }
  0x17   :  { %248 = dma.done.wait [#allocation3], 64  }
  0x18   :  { %249 = vsyncadd [#allocation3], 4294967232 }
  0x19   :  { %250 = dma.done.wait [#allocation6], 512  }
  0x1a   :  { %251 = vsyncadd [#allocation6], 4294966784  ;;  %v258_v0 = vmov 0.0   ;;  %vm259_vm0 = vmmov 0   ;;  %v45_v1 = vld [vmem:[#allocation5 + $0x18] sm:$0xff]  ;;  %v44_v2 = vld [vmem:[#allocation5 + $0x10] sm:$0xff] }
  0x1b   :  { %166 = vmatprep.subr.mxu0 %v258_v0  ;;  %174 = vmatprep.mubr.msk.f32.mxu0 %vm259_vm0, %v258_v0  ;;  %v43_v3 = vld [vmem:[#allocation5 + $0x8] sm:$0xff]  ;;  %v42_v4 = vld [vmem:[#allocation5] sm:$0xff]  ;;  %v41_v5 = vld [vmem:[#allocation2] sm:$0xf]  ;;  %vm53_vm1 = vcmask 261120   ;;  %vm127_vm2 = vcmask 1043456  }
  0x1c   :  { %167 = vmatpush3.msra.mxu0 %v45_v1  ;;  %v159_v6 = vld [vmem:[%s295_s2] ss:$0 sm:$0xff]  ;;  %s260_s24 = smov [#allocation7]  }
  0x1d   :  { %168 = vmatprep.subr.mxu0 %v258_v0  ;;  %s149_s2 = sshll.u32 %s260_s24, 4  ;;  %s150_s2 = int_to_ptr.vmem [resolvable:$true] %s149_s2 }
  0x1e   :  { %169 = vmatpush3.msra.mxu0 %v44_v2  ;;  %s228_s25 = scalar_lea.vmem %s150_s2, 64  ;;  %p233_p11 = scmp.lt.s32.totalorder %s150_s2, %s150_s2 }
  0x1f   :  { %170 = vmatprep.subr.mxu0 %v258_v0  ;;  %p229_p10 = scmp.ne.s32.totalorder %s150_s2, %s228_s25  ;;  %p234_p12 = scmp.lt.s32.totalorder %s228_s25, %s228_s25 }
  0x20   :  { %171 = vmatpush3.msra.mxu0 %v43_v3 }
  0x21   :  { %172 = vmatprep.subr.mxu0 %v258_v0  ;;  %p235_p13 = por %p234_p12, %p233_p11 }
  0x22   :  { %173 = vmatpush3.msra.mxu0 %v42_v4 }
  0x23   :  { %175 = vmatmul.mubr.msk.f32.vlgmr.msra.gmra.mxu0 %vm53_vm1, %v41_v5  ;;  %p236_p0 = pnand %p235_p13, %p229_p10 }
  0xe3   :  { %v123_v7 = vpop.f32.mrf.mxu0 }
  0xe4   :  { %v124_v8 = vadd.f32 %v159_v6, %v123_v7 }
  0xe5   :  { %v176_v9 = vpop.f32.mrf.mxu0 }
  0xe6   :  { %v128_v10 = vsel %vm127_vm2, %v124_v8, -inf }
  0xe7   :  { %129 = vmax.xlane.f32.xlu0 %v128_v10 }
 0x170   :  { %v130_v11 = vpop.xlane.xlu0 %129 }
 0x171   :  { %v131_v12 = vsub.f32 %v124_v8, %v130_v11 }
 0x173   :  { %v132_v13 = vmul.f32 1.442695, %v131_v12 }
 0x175   :  { %184 = vpow2.f32 %v132_v13 }
 0x182   :  { %v185_v14 = vpop.eup %184 }
 0x183   :  { %v134_v15 = vsel %vm127_vm2, %v185_v14, 0.0 }
 0x184   :  { %135 = vadd.xlane.f32.xlu0 %v134_v15 }
 0x20d   :  { %v136_v16 = vpop.xlane.xlu0 %135 }
 0x20e   :  { %186 = vrcp.f32 %v136_v16 }
 0x21b   :  { %v187_v17 = vpop.eup %186 }
 0x21c   :  { %v138_v18 = vmul.f32 %v187_v17, %v136_v16 }
 0x21e   :  { %v139_v19 = vsub.f32 2.0, %v138_v18 }
 0x220   :  { %v140_v20 = vmul.f32 %v187_v17, %v139_v19 }
 0x222   :  { %v141_v21 = vmul.f32 %v185_v14, %v140_v20 }
 0x224   :  { %142 = vst [vmem:[#allocation7] sm:$0xf] %v141_v21 }
 0x225   :  { %239 = shalt.err (!%p236_p0)
}
 0x226   :  { %152 = dma.vmem_to_hbm [thread:$0]  %s150_s2, 64, %s296_s3, [#allocation4]  }
 0x227   :  { %252 = dma.done.wait [#allocation4], 64  }
 0x228   :  { %253 = vsyncadd [#allocation4], 4294967232 }
 0x229   :  { %156 = vsyncpa [#allocation3], 1 }
 0x22a   :  { %157 = vsyncpa [#allocation6], 1 }
 0x22b   :  { %158 = vsyncpa [#allocation4], 1 }

// kernel: tpu_custom_call.1
= control target key start
LH: loop header
LB: loop body
LE: loop exit
PB: predicated region body
PF: predicated region fallthrough
CT: control target
= control target key end

     0   :  { %8 = vsyncpa [#allocation3], 0  ;;  %s293_s0 = inlined_call_operand.hbm [shape: f32[4,32], index: 0, kind: input, shape index: {}]   ;;  %s294_s1 = inlined_call_operand.hbm [shape: f32[32,128], index: 1, kind: input, shape index: {}]   ;;  %s295_s2 = inlined_call_operand.vmem [shape: f32[1,128], index: 2, kind: input, shape index: {}]   ;;  %s296_s3 = inlined_call_operand.hbm [shape: f32[4,128], index: 3, kind: output, shape index: {}]  }
   0x1   :  { %9 = vsyncpa [#allocation6], 0 }
   0x2   :  { %10 = vsyncpa [#allocation4], 0  ;;  %s254_s12 = smov [#allocation2]   ;;  %s255_s14 = smov [#allocation5]  }
   0x3   :  { %s17_s13 = sshll.u32 %s254_s12, 4  ;;  %s26_s15 = sshll.u32 %s255_s14, 4  ;;  %s18_s13 = int_to_ptr.vmem [resolvable:$true] %s17_s13  ;;  %s27_s15 = int_to_ptr.vmem [resolvable:$true] %s26_s15 }
   0x4   :  { %s196_s16 = scalar_lea.vmem %s18_s13, 64  ;;  %p201_p1 = scmp.lt.s32.totalorder %s18_s13, %s18_s13 }
   0x5   :  { %p197_p0 = scmp.ne.s32.totalorder %s18_s13, %s196_s16  ;;  %p202_p2 = scmp.lt.s32.totalorder %s196_s16, %s196_s16 }
   0x7   :  { %p203_p3 = por %p202_p2, %p201_p1 }
   0x9   :  { %p204_p4 = pnand %p203_p3, %p197_p0 }
   0xb   :  { %207 = shalt.err (!%p204_p4)
}
   0xc   :  { %20 = dma.hbm_to_vmem [thread:$0]  %s293_s0, 64, %s18_s13, [#allocation3]  }
   0xd   :  { %s216_s19 = scalar_lea.vmem %s27_s15, 512  ;;  %p221_p6 = scmp.lt.s32.totalorder %s27_s15, %s27_s15 }
   0xe   :  { %p217_p5 = scmp.ne.s32.totalorder %s27_s15, %s216_s19  ;;  %p222_p7 = scmp.lt.s32.totalorder %s216_s19, %s216_s19 }
  0x10   :  { %p223_p8 = por %p222_p7, %p221_p6 }
  0x12   :  { %p224_p9 = pnand %p223_p8, %p217_p5 }
  0x14   :  { %227 = shalt.err (!%p224_p9)
}
  0x15   :  { %s256_s20 = smov 128   ;;  %s257_s21 = smov 8  }
  0x16   :  { %32 = dma.hbm_to_vmem [thread:$0]  %s294_s1, 512, %s27_s15, [#allocation6], %s256_s20, %s256_s20, %s257_s21  }
  0x17   :  { %248 = dma.done.wait [#allocation3], 64  }
  0x18   :  { %249 = vsyncadd [#allocation3], 4294967232 }
  0x19   :  { %250 = dma.done.wait [#allocation6], 512  }
  0x1a   :  { %251 = vsyncadd [#allocation6], 4294966784  ;;  %v258_v0 = vmov 0.0   ;;  %vm259_vm0 = vmmov 0   ;;  %v45_v1 = vld [vmem:[#allocation5 + $0x18] sm:$0xff]  ;;  %v44_v2 = vld [vmem:[#allocation5 + $0x10] sm:$0xff] }
  0x1b   :  { %166 = vmatprep.subr.mxu0 %v258_v0  ;;  %174 = vmatprep.mubr.msk.f32.mxu0 %vm259_vm0, %v258_v0  ;;  %v43_v3 = vld [vmem:[#allocation5 + $0x8] sm:$0xff]  ;;  %v42_v4 = vld [vmem:[#allocation5] sm:$0xff]  ;;  %v41_v5 = vld [vmem:[#allocation2] sm:$0xf]  ;;  %vm53_vm1 = vcmask 261120   ;;  %vm127_vm2 = vcmask 1043456  }
  0x1c   :  { %167 = vmatpush3.msra.mxu0 %v45_v1  ;;  %v159_v6 = vld [vmem:[%s295_s2] ss:$0 sm:$0xff]  ;;  %s260_s24 = smov [#allocation7]  }
  0x1d   :  { %168 = vmatprep.subr.mxu0 %v258_v0  ;;  %s149_s2 = sshll.u32 %s260_s24, 4  ;;  %s150_s2 = int_to_ptr.vmem [resolvable:$true] %s149_s2 }
  0x1e   :  { %169 = vmatpush3.msra.mxu0 %v44_v2  ;;  %s228_s25 = scalar_lea.vmem %s150_s2, 64  ;;  %p233_p11 = scmp.lt.s32.totalorder %s150_s2, %s150_s2 }
  0x1f   :  { %170 = vmatprep.subr.mxu0 %v258_v0  ;;  %p229_p10 = scmp.ne.s32.totalorder %s150_s2, %s228_s25  ;;  %p234_p12 = scmp.lt.s32.totalorder %s228_s25, %s228_s25 }
  0x20   :  { %171 = vmatpush3.msra.mxu0 %v43_v3 }
  0x21   :  { %172 = vmatprep.subr.mxu0 %v258_v0  ;;  %p235_p13 = por %p234_p12, %p233_p11 }
  0x22   :  { %173 = vmatpush3.msra.mxu0 %v42_v4 }
  0x23   :  { %175 = vmatmul.mubr.msk.f32.vlgmr.msra.gmra.mxu0 %vm53_vm1, %v41_v5  ;;  %p236_p0 = pnand %p235_p13, %p229_p10 }
  0xe3   :  { %v123_v7 = vpop.f32.mrf.mxu0 }
  0xe4   :  { %v124_v8 = vadd.f32 %v159_v6, %v123_v7 }
  0xe5   :  { %v176_v9 = vpop.f32.mrf.mxu0 }
  0xe6   :  { %v128_v10 = vsel %vm127_vm2, %v124_v8, -inf }
  0xe7   :  { %129 = vmax.xlane.f32.xlu0 %v128_v10 }
 0x170   :  { %v130_v11 = vpop.xlane.xlu0 %129 }
 0x171   :  { %v131_v12 = vsub.f32 %v124_v8, %v130_v11 }
 0x173   :  { %v132_v13 = vmul.f32 1.442695, %v131_v12 }
 0x175   :  { %184 = vpow2.f32 %v132_v13 }
 0x182   :  { %v185_v14 = vpop.eup %184 }
 0x183   :  { %v134_v15 = vsel %vm127_vm2, %v185_v14, 0.0 }
 0x184   :  { %135 = vadd.xlane.f32.xlu0 %v134_v15 }
 0x20d   :  { %v136_v16 = vpop.xlane.xlu0 %135 }
 0x20e   :  { %186 = vrcp.f32 %v136_v16 }
 0x21b   :  { %v187_v17 = vpop.eup %186 }
 0x21c   :  { %v138_v18 = vmul.f32 %v187_v17, %v136_v16 }
 0x21e   :  { %v139_v19 = vsub.f32 2.0, %v138_v18 }
 0x220   :  { %v140_v20 = vmul.f32 %v187_v17, %v139_v19 }
 0x222   :  { %v141_v21 = vmul.f32 %v185_v14, %v140_v20 }
 0x224   :  { %142 = vst [vmem:[#allocation7] sm:$0xf] %v141_v21 }
 0x225   :  { %239 = shalt.err (!%p236_p0)
}
 0x226   :  { %152 = dma.vmem_to_hbm [thread:$0]  %s150_s2, 64, %s296_s3, [#allocation4]  }
 0x227   :  { %252 = dma.done.wait [#allocation4], 64  }
 0x228   :  { %253 = vsyncadd [#allocation4], 4294967232 }
 0x229   :  { %156 = vsyncpa [#allocation3], 1 }
 0x22a   :  { %157 = vsyncpa [#allocation6], 1 }
 0x22b   :  { %158 = vsyncpa [#allocation4], 1 }

</bundles_post_ra>
